<compile_context>
chip_gen: v7x
topology: tpu7x:2x2x1
jax: 0.10.0
libtpu: 0.0.40
codegen_flags: <defaults>
</compile_context>

<pallas_src>
import jax
import jax.numpy as jnp
from jax.experimental import pallas as pl
from jax.experimental.pallas import tpu as pltpu

MNIST_D = 784     # contraction dim (natural width, not padded for x)
MNIST_K = 10      # real number of classes
K_PAD = 128       # lane-dense class / output dim
NEG_BIG = -1e30   # bias for padded (fake) classes: exp underflows to exactly 0


def _round_up(n, m):
    return (n + m - 1) // m * m


def _linear_logsoftmax_kernel(x_ref, w_ref, b_ref, o_ref):
    # x_ref: (tb, 784) f32, w_ref: (784, 128) f32,
    # b_ref: (1, 128) f32,  o_ref: (tb, 128) f32
    logits = jnp.dot(x_ref[...], w_ref[...],
                     preferred_element_type=jnp.float32) + b_ref[...]
    # Padded class columns carry bias = NEG_BIG (added in-kernel — do not hoist
    # the bias add): they never win the row max and exp() underflows to 0, so
    # the log-softmax over the 10 real classes is exact.  Max-shifted form:
    m = jnp.max(logits, axis=-1, keepdims=True)
    shifted = logits - m
    lse = jnp.log(jnp.sum(jnp.exp(shifted), axis=-1, keepdims=True))
    o_ref[...] = shifted - lse


def prepare_params(w, b):
    """Pad W^T / bias once (hoisted out of the per-call path).

    w: (10, 784), b: (10,) -> w_t: (784, 128), b_p: (1, 128)
    """
    w_t = jnp.zeros((MNIST_D, K_PAD), jnp.float32).at[:, :MNIST_K].set(
        w.astype(jnp.float32).T)
    b_p = jnp.full((1, K_PAD), NEG_BIG, jnp.float32).at[0, :MNIST_K].set(
        b.astype(jnp.float32))
    return w_t, b_p


def _choose_tile(B, tb_req):
    # Batch tile: multiple of 8 sublanes, capped by the (row-padded) batch.
    tb = max(8, min(_round_up(tb_req, 8), _round_up(B, 8)))
    # Guarantee >= 2 grid steps for moderate B so the "parallel" batch axis can
    # shard across v7x's 2 TensorCores (one giant tile would idle a core).
    if B > 8 and -(-B // tb) < 2:
        tb = max(8, _round_up(-(-B // 2), 8))
    return tb


def linear_log_softmax_prepared(x, w_t, b_p, *, tb=2048):
    """Forward with pre-padded params (w_t: (784,128), b_p: (1,128))."""
    x2d = x.reshape(-1, MNIST_D).astype(jnp.float32)
    B = x2d.shape[0]

    tb = _choose_tile(B, tb)
    B_pad = _round_up(B, tb)

    # Pad the batch only when the last tile would be ragged.
    if B_pad != B:
        x_in = jnp.concatenate(
            [x2d, jnp.zeros((B_pad - B, MNIST_D), jnp.float32)], axis=0)
    else:
        x_in = x2d

    grid = (B_pad // tb,)

    # Advisory cost: real flops (unpadded K) and real byte traffic.
    cost = pl.CostEstimate(
        flops=2 * B * MNIST_D * MNIST_K,
        bytes_accessed=(B_pad * MNIST_D        # x read
                        + B_pad * K_PAD        # out write (128-wide)
                        + MNIST_D * K_PAD      # W read
                        + K_PAD) * 4,          # bias read
        transcendentals=B_pad * K_PAD,
    )

    out = pl.pallas_call(
        _linear_logsoftmax_kernel,
        out_shape=jax.ShapeDtypeStruct((B_pad, K_PAD), jnp.float32),
        grid_spec=pltpu.PrefetchScalarGridSpec(
            num_scalar_prefetch=0,
            grid=grid,
            in_specs=[
                # x streamed at natural 784 width (block last dim == array dim)
                pl.BlockSpec((tb, MNIST_D), lambda i: (i, 0)),
                pl.BlockSpec((MNIST_D, K_PAD), lambda i: (0, 0)),  # VMEM-resident
                pl.BlockSpec((1, K_PAD), lambda i: (0, 0)),        # VMEM-resident
            ],
            out_specs=pl.BlockSpec((tb, K_PAD), lambda i: (i, 0)),
        ),
        compiler_params=pltpu.CompilerParams(
            dimension_semantics=("parallel",),
            vmem_limit_bytes=48 << 20,   # tb=2048 f32 double-buffered ~15 MiB;
                                         # 48 MiB is safe on v5e/v6e/v7x.
        ),
        cost_estimate=cost,
    )(x_in, w_t, b_p)

    # Slice off padded batch rows and the 118 padded class columns.
    return out[:B, :MNIST_K]


def linear_log_softmax(x, w, b, *, tb=2048):
    """Convenience wrapper taking raw (10,784) / (10,) params.

    For latency-sensitive repeated calls, call prepare_params() once and use
    linear_log_softmax_prepared() instead.
    """
    w_t, b_p = prepare_params(w, b)
    return linear_log_softmax_prepared(x, w_t, b_p, tb=tb)


def _reference(x, w, b):
    logits = x.reshape(-1, MNIST_D) @ w.T + b
    return jax.nn.log_softmax(logits, axis=-1)


if __name__ == "__main__":
    key = jax.random.PRNGKey(0)
    kx, kw, kb = jax.random.split(key, 3)

    # Deterministic params mirroring torch.nn.Linear default init
    # (uniform in [-1/sqrt(in_features), 1/sqrt(in_features)]).
    bound = 1.0 / (MNIST_D ** 0.5)
    w = jax.random.uniform(kw, (MNIST_K, MNIST_D), jnp.float32, -bound, bound)
    b = jax.random.uniform(kb, (MNIST_K,), jnp.float32, -bound, bound)

    # Small MNIST-like batch: (B=8, 1, 28, 28) -> view(-1, 784)
    x = jax.random.normal(kx, (8, 1, 28, 28), jnp.float32)

    # Param padding hoisted out of the per-call path.
    w_t, b_p = prepare_params(w, b)

    out = linear_log_softmax_prepared(x, w_t, b_p)
    jax.block_until_ready(out)

    ref = _reference(x, w, b)
    assert out.shape == (8, MNIST_K)
    assert jnp.allclose(out, ref, atol=1e-5, rtol=1e-5)

    print("KERNEL_OK")
</pallas_src>

<mosaic_0001>
module attributes {stable_mosaic.version = 11 : i64} {
  func.func @_linear_logsoftmax_kernel(%arg0: i32, %arg1: memref<8x784xf32, #tpu.memory_space<vmem>>, %arg2: memref<784x128xf32, #tpu.memory_space<vmem>>, %arg3: memref<1x128xf32, #tpu.memory_space<vmem>>, %arg4: memref<8x128xf32, #tpu.memory_space<vmem>>) attributes {dimension_semantics = [#tpu.dimension_semantics<parallel>], iteration_bounds = array<i64: 1>, scalar_prefetch = 0 : i64, scratch_operands = 0 : i64, tpu.core_type = #tpu.core_type<tc>, window_params = [{transform_indices = @transform_0, window_bounds = array<i64: 8, 784>}, {pipeline_mode = #tpu.pipeline_mode<synchronous>, transform_indices = @transform_1, window_bounds = array<i64: 784, 128>}, {pipeline_mode = #tpu.pipeline_mode<synchronous>, transform_indices = @transform_2, window_bounds = array<i64: 1, 128>}, {transform_indices = @transform_3, window_bounds = array<i64: 8, 128>}]} {
    %c0 = arith.constant 0 : index
    %c0_0 = arith.constant 0 : index
    %0 = vector.load %arg1[%c0, %c0_0] : memref<8x784xf32, #tpu.memory_space<vmem>>, vector<8x784xf32>
    %c0_1 = arith.constant 0 : index
    %c0_2 = arith.constant 0 : index
    %1 = vector.load %arg2[%c0_1, %c0_2] : memref<784x128xf32, #tpu.memory_space<vmem>>, vector<784x128xf32>
    %cst = arith.constant dense<0.000000e+00> : vector<8x128xf32>
    %2 = tpu.matmul %0, %1, %cst {dimension_numbers = #tpu.dot_dimension_numbers<[1], [0], [0], [1], [0, 0, 1, 1], [], []>} : vector<8x784xf32>, vector<784x128xf32>, vector<8x128xf32> -> vector<8x128xf32>
    %c0_3 = arith.constant 0 : index
    %c0_4 = arith.constant 0 : index
    %3 = vector.load %arg3[%c0_3, %c0_4] : memref<1x128xf32, #tpu.memory_space<vmem>>, vector<1x128xf32>
    %4 = vector.broadcast %3 : vector<1x128xf32> to vector<8x128xf32>
    %5 = arith.addf %2, %4 : vector<8x128xf32>
    %cst_5 = arith.constant dense<0xFF800000> : vector<8xf32>
    %6 = vector.multi_reduction <maximumf>, %5, %cst_5 [1] : vector<8x128xf32> to vector<8xf32>
    %7 = vector.shape_cast %6 : vector<8xf32> to vector<8x1xf32>
    %8 = vector.broadcast %7 : vector<8x1xf32> to vector<8x128xf32>
    %9 = arith.subf %5, %8 : vector<8x128xf32>
    %10 = math.exp %9 : vector<8x128xf32>
    %cst_6 = arith.constant dense<0.000000e+00> : vector<8xf32>
    %11 = vector.multi_reduction <add>, %10, %cst_6 [1] : vector<8x128xf32> to vector<8xf32>
    %12 = vector.shape_cast %11 : vector<8xf32> to vector<8x1xf32>
    %13 = math.log %12 : vector<8x1xf32>
    %14 = vector.broadcast %13 : vector<8x1xf32> to vector<8x128xf32>
    %15 = arith.subf %9, %14 : vector<8x128xf32>
    %c0_7 = arith.constant 0 : index
    %c0_8 = arith.constant 0 : index
    %16 = vector.load %arg4[%c0_7, %c0_8] : memref<8x128xf32, #tpu.memory_space<vmem>>, vector<8x128xf32>
    tpu.vector_store %arg4[%c0_7, %c0_8], %15 {strides = array<i32>} : memref<8x128xf32, #tpu.memory_space<vmem>>, vector<8x128xf32>,
    return
  }
  func.func @transform_0(%arg0: i32) -> (i32, i32) {
    %c0_i32 = arith.constant 0 : i32
    %c0_i32_0 = arith.constant 0 : i32
    return %arg0, %c0_i32 : i32, i32
  }
  func.func @transform_1(%arg0: i32) -> (i32, i32) {
    %c0_i32 = arith.constant 0 : i32
    %c0_i32_0 = arith.constant 0 : i32
    %c0_i32_1 = arith.constant 0 : i32
    return %c0_i32, %c0_i32_0 : i32, i32
  }
  func.func @transform_2(%arg0: i32) -> (i32, i32) {
    %c0_i32 = arith.constant 0 : i32
    %c0_i32_0 = arith.constant 0 : i32
    %c0_i32_1 = arith.constant 0 : i32
    return %c0_i32, %c0_i32_0 : i32, i32
  }
  func.func @transform_3(%arg0: i32) -> (i32, i32) {
    %c0_i32 = arith.constant 0 : i32
    %c0_i32_0 = arith.constant 0 : i32
    return %arg0, %c0_i32 : i32, i32
  }
}

</mosaic_0001>

<bundles_post_ra>
// kernel: tpu_custom_call.1
= control target key start
LH: loop header
LB: loop body
LE: loop exit
PB: predicated region body
PF: predicated region fallthrough
CT: control target
= control target key end

     0   :  { %8 = vsyncpa [#allocation3], 0  ;;  %s838_s0 = inlined_call_operand.hbm [shape: f32[8,784], index: 0, kind: input, shape index: {}]   ;;  %s839_s1 = inlined_call_operand.hbm [shape: f32[784,128], index: 1, kind: input, shape index: {}]   ;;  %s840_s2 = inlined_call_operand.vmem [shape: f32[1,128], index: 2, kind: input, shape index: {}]   ;;  %s841_s3 = inlined_call_operand.hbm [shape: f32[8,128], index: 3, kind: output, shape index: {}]  }
   0x1   :  { %9 = vsyncpa [#allocation6], 0 }
   0x2   :  { %10 = vsyncpa [#allocation4], 0  ;;  %s764_s12 = smov [#allocation2]   ;;  %s765_s14 = smov [#allocation5]  }
   0x3   :  { %s17_s13 = sshll.u32 %s764_s12, 4  ;;  %s26_s15 = sshll.u32 %s765_s14, 4  ;;  %s18_s13 = int_to_ptr.vmem [resolvable:$true] %s17_s13  ;;  %s792_s15 = int_to_ptr.vmem [resolvable:$true] %s26_s15 }
   0x4   :  { %s692_s18 = scalar_lea.hbm %s838_s0, 896 }
   0x5   :  { %p693_p0 = scmp.ne.s32.totalorder %s838_s0, %s692_s18  ;;  %p696_p1 = scmp.lt.u32.totalorder %s692_s18, %s838_s0 }
   0x7   :  { %p698_p2 = pnand %p696_p1, %p693_p0 }
   0x9   :  { %701 = shalt.err (!%p698_p2)
}
   0xa   :  { %s702_s23 = scalar_lea.vmem %s18_s13, 896  ;;  %p707_p4 = scmp.lt.s32.totalorder %s18_s13, %s18_s13 }
   0xb   :  { %p703_p3 = scmp.ne.s32.totalorder %s18_s13, %s702_s23  ;;  %p708_p5 = scmp.lt.s32.totalorder %s702_s23, %s702_s23 }
   0xd   :  { %p709_p6 = por %p708_p5, %p707_p4 }
   0xf   :  { %p710_p7 = pnand %p709_p6, %p703_p3 }
  0x11   :  { %713 = shalt.err (!%p710_p7)
}
  0x12   :  { %20 = dma.hbm_to_vmem [thread:$0]  %s838_s0, 896, %s18_s13, [#allocation3]  }
  0x13   :  { %s714_s28 = scalar_lea.hbm %s839_s1, 12544 }
  0x14   :  { %p715_p8 = scmp.ne.s32.totalorder %s839_s1, %s714_s28  ;;  %p718_p9 = scmp.lt.u32.totalorder %s714_s28, %s839_s1 }
  0x16   :  { %p720_p10 = pnand %p718_p9, %p715_p8 }
  0x18   :  { %723 = shalt.err (!%p720_p10)
}
  0x19   :  { %s724_s6 = scalar_lea.vmem %s792_s15, 12544  ;;  %p729_p12 = scmp.lt.s32.totalorder %s792_s15, %s792_s15 }
  0x1a   :  { %p725_p11 = scmp.ne.s32.totalorder %s792_s15, %s724_s6  ;;  %p730_p13 = scmp.lt.s32.totalorder %s724_s6, %s724_s6 }
  0x1c   :  { %p731_p0 = por %p730_p13, %p729_p12 }
  0x1e   :  { %p732_p1 = pnand %p731_p0, %p725_p11 }
  0x20   :  { %735 = shalt.err (!%p732_p1)
}
  0x21   :  { %s766_s0 = smov 128   ;;  %s767_s7 = smov 8  }
  0x22   :  { %32 = dma.hbm_to_vmem [thread:$0]  %s839_s1, 12544, %s792_s15, [#allocation6], %s766_s0, %s766_s0, %s767_s7  }
  0x23   :  { %758 = dma.done.wait [#allocation3], 896  }
  0x24   :  { %759 = vsyncadd [#allocation3], 4294966400 }
  0x25   :  { %760 = dma.done.wait [#allocation6], 12544  }
  0x26   :  { %761 = vsyncadd [#allocation6], 4294954752  ;;  %v64_v0 = vld [vmem:[#allocation5 + $0x80] sm:$0xff]  ;;  %v65_v1 = vld [vmem:[#allocation5 + $0x88] sm:$0xff]  ;;  %vm769_vm0 = vmmov 0   ;;  %vm153_vm1 = vcmask 130048  }
  0x27   :  { %v48_v2 = vld [vmem:[#allocation5] sm:$0xff]  ;;  %v581_v3 = vpack.c.bf16 %v65_v1, %v64_v0  ;;  %v49_v4 = vld [vmem:[#allocation5 + $0x8] sm:$0xff]  ;;  %v66_v11 = vld [vmem:[#allocation5 + $0x90] sm:$0xff] }
  0x28   :  { %v96_v5 = vld [vmem:[#allocation5 + $0x180] sm:$0xff]  ;;  %v97_v6 = vld [vmem:[#allocation5 + $0x188] sm:$0xff]  ;;  %v583_v7 = vpack.c.bf16 %v49_v4, %v48_v2  ;;  %v67_v13 = vld [vmem:[#allocation5 + $0x98] sm:$0xff] }
  0x29   :  { %v613_v8 = vpack.c.bf16 %v97_v6, %v96_v5  ;;  %v80_v9 = vld [vmem:[#allocation5 + $0x100] sm:$0xff]  ;;  %v81_v10 = vld [vmem:[#allocation5 + $0x108] sm:$0xff]  ;;  %582 = vmatprep.subr.bf16.mxu0 %v581_v3  ;;  %v50_v14 = vld [vmem:[#allocation5 + $0x10] sm:$0xff]  ;;  %v585_v16 = vpack.c.bf16 %v67_v13, %v66_v11 }
  0x2a   :  { %v615_v12 = vpack.c.bf16 %v81_v10, %v80_v9  ;;  %v51_v15 = vld [vmem:[#allocation5 + $0x18] sm:$0xff]  ;;  %584 = vmatpush3.bf16.msra.mxu0 %v583_v7  ;;  %v98_v18 = vld [vmem:[#allocation5 + $0x190] sm:$0xff]  ;;  %v68_v23 = vld [vmem:[#allocation5 + $0xa0] sm:$0xff] }
  0x2b   :  { %614 = vmatprep.subr.bf16.mxu1 %v613_v8  ;;  %v587_v17 = vpack.c.bf16 %v51_v15, %v50_v14  ;;  %v99_v19 = vld [vmem:[#allocation5 + $0x198] sm:$0xff]  ;;  %v82_v20 = vld [vmem:[#allocation5 + $0x110] sm:$0xff]  ;;  %v69_v24 = vld [vmem:[#allocation5 + $0xa8] sm:$0xff]  ;;  %586 = vmatprep.subr.bf16.mxu0 %v585_v16 }
  0x2c   :  { %616 = vmatpush3.bf16.msra.mxu1 %v615_v12  ;;  %v617_v21 = vpack.c.bf16 %v99_v19, %v98_v18  ;;  %v83_v22 = vld [vmem:[#allocation5 + $0x118] sm:$0xff]  ;;  %v589_v26 = vpack.c.bf16 %v69_v24, %v68_v23  ;;  %v52_v27 = vld [vmem:[#allocation5 + $0x20] sm:$0xff]  ;;  %v53_v28 = vld [vmem:[#allocation5 + $0x28] sm:$0xff] }
  0x2d   :  { %v619_v25 = vpack.c.bf16 %v83_v22, %v82_v20  ;;  %v100_v29 = vld [vmem:[#allocation5 + $0x1a0] sm:$0xff]  ;;  %v101_v30 = vld [vmem:[#allocation5 + $0x1a8] sm:$0xff]  ;;  %v591_v33 = vpack.c.bf16 %v53_v28, %v52_v27  ;;  %v70_v35 = vld [vmem:[#allocation5 + $0xb0] sm:$0xff] }
  0x2e   :  { %618 = vmatprep.subr.bf16.mxu1 %v617_v21  ;;  %v84_v31 = vld [vmem:[#allocation5 + $0x120] sm:$0xff]  ;;  %v85_v32 = vld [vmem:[#allocation5 + $0x128] sm:$0xff]  ;;  %588 = vmatpush3.bf16.msra.mxu0 %v587_v17  ;;  %v621_v34 = vpack.c.bf16 %v101_v30, %v100_v29  ;;  %v71_v36 = vld [vmem:[#allocation5 + $0xb8] sm:$0xff] }
  0x2f   :  { %v54_v37 = vld [vmem:[#allocation5 + $0x30] sm:$0xff]  ;;  %590 = vmatprep.subr.bf16.mxu0 %v589_v26  ;;  %v623_v38 = vpack.c.bf16 %v85_v32, %v84_v31  ;;  %v593_v39 = vpack.c.bf16 %v71_v36, %v70_v35  ;;  %v55_v40 = vld [vmem:[#allocation5 + $0x38] sm:$0xff]  ;;  %v72_v46 = vld [vmem:[#allocation5 + $0xc0] sm:$0xff] }
  0x30   :  { %620 = vmatpush3.bf16.msra.mxu1 %v619_v25  ;;  %v102_v41 = vld [vmem:[#allocation5 + $0x1b0] sm:$0xff]  ;;  %v103_v42 = vld [vmem:[#allocation5 + $0x1b8] sm:$0xff]  ;;  %v73_v47 = vld [vmem:[#allocation5 + $0xc8] sm:$0xff]  ;;  %v595_v48 = vpack.c.bf16 %v55_v40, %v54_v37 }
  0x31   :  { %622 = vmatprep.subr.bf16.mxu1 %v621_v34  ;;  %v625_v43 = vpack.c.bf16 %v103_v42, %v102_v41  ;;  %v86_v44 = vld [vmem:[#allocation5 + $0x130] sm:$0xff]  ;;  %v87_v45 = vld [vmem:[#allocation5 + $0x138] sm:$0xff]  ;;  %v104_v49 = vld [vmem:[#allocation5 + $0x1c0] sm:$0xff]  ;;  %v597_v52 = vpack.c.bf16 %v73_v47, %v72_v46 }
  0x32   :  { %592 = vmatpush3.bf16.msra.mxu0 %v591_v33  ;;  %v105_v50 = vld [vmem:[#allocation5 + $0x1c8] sm:$0xff]  ;;  %v627_v51 = vpack.c.bf16 %v87_v45, %v86_v44  ;;  %v56_v53 = vld [vmem:[#allocation5 + $0x40] sm:$0xff]  ;;  %v74_v58 = vld [vmem:[#allocation5 + $0xd0] sm:$0xff] }
  0x33   :  { %594 = vmatprep.subr.bf16.mxu0 %v593_v39  ;;  %v57_v54 = vld [vmem:[#allocation5 + $0x48] sm:$0xff]  ;;  %v88_v55 = vld [vmem:[#allocation5 + $0x140] sm:$0xff]  ;;  %v629_v56 = vpack.c.bf16 %v105_v50, %v104_v49  ;;  %v75_v59 = vld [vmem:[#allocation5 + $0xd8] sm:$0xff]  ;;  %v768_v50 = vmov 0.0|0.0  }
  0x34   :  { %624 = vmatpush3.bf16.msra.mxu1 %v623_v38  ;;  %v89_v57 = vld [vmem:[#allocation5 + $0x148] sm:$0xff]  ;;  %v106_v60 = vld [vmem:[#allocation5 + $0x1d0] sm:$0xff]  ;;  %v107_v61 = vld [vmem:[#allocation5 + $0x1d8] sm:$0xff]  ;;  %v599_v62 = vpack.c.bf16 %v57_v54, %v56_v53  ;;  %v601_v0 = vpack.c.bf16 %v75_v59, %v74_v58 }
  0x35   :  { %626 = vmatprep.subr.bf16.mxu1 %v625_v43  ;;  %v631_v63 = vpack.c.bf16 %v89_v57, %v88_v55  ;;  %v58_v1 = vld [vmem:[#allocation5 + $0x50] sm:$0xff]  ;;  %v59_v2 = vld [vmem:[#allocation5 + $0x58] sm:$0xff]  ;;  %v633_v4 = vpack.c.bf16 %v107_v61, %v106_v60  ;;  %v76_v6 = vld [vmem:[#allocation5 + $0xe0] sm:$0xff]  ;;  %v770_v60 = vmov 0.0  }
  0x36   :  { %596 = vmatpush3.bf16.msra.mxu0 %v595_v48  ;;  %v90_v3 = vld [vmem:[#allocation5 + $0x150] sm:$0xff]  ;;  %v91_v5 = vld [vmem:[#allocation5 + $0x158] sm:$0xff]  ;;  %v77_v7 = vld [vmem:[#allocation5 + $0xe8] sm:$0xff]  ;;  %v603_v10 = vpack.c.bf16 %v59_v2, %v58_v1 }
  0x37   :  { %598 = vmatprep.subr.bf16.mxu0 %v597_v52  ;;  %v108_v8 = vld [vmem:[#allocation5 + $0x1e0] sm:$0xff]  ;;  %v109_v9 = vld [vmem:[#allocation5 + $0x1e8] sm:$0xff]  ;;  %v42_v12 = vld [vmem:[#allocation2 + $0x8] sm:$0xff]  ;;  %v635_v13 = vpack.c.bf16 %v91_v5, %v90_v3  ;;  %v605_v14 = vpack.c.bf16 %v77_v7, %v76_v6 }
  0x38   :  { %628 = vmatpush3.bf16.msra.mxu1 %v627_v51  ;;  %v60_v11 = vld [vmem:[#allocation5 + $0x60] sm:$0xff]  ;;  %v61_v15 = vld [vmem:[#allocation5 + $0x68] sm:$0xff]  ;;  %v637_v18 = vpack.c.bf16 %v109_v9, %v108_v8  ;;  %v78_v19 = vld [vmem:[#allocation5 + $0xf0] sm:$0xff]  ;;  %221 = vmatprep.mubr.f32.mxu0 %v42_v12 }
  0x39   :  { %630 = vmatprep.subr.bf16.mxu1 %v629_v56  ;;  %v92_v16 = vld [vmem:[#allocation5 + $0x160] sm:$0xff]  ;;  %v93_v17 = vld [vmem:[#allocation5 + $0x168] sm:$0xff]  ;;  %v79_v20 = vld [vmem:[#allocation5 + $0xf8] sm:$0xff]  ;;  %v607_v24 = vpack.c.bf16 %v61_v15, %v60_v11 }
  0x3a   :  { %600 = vmatpush3.bf16.msra.mxu0 %v599_v62  ;;  %v44_v21 = vld [vmem:[#allocation2 + $0x18] sm:$0xff]  ;;  %v110_v22 = vld [vmem:[#allocation5 + $0x1f0] sm:$0xff]  ;;  %v111_v23 = vld [vmem:[#allocation5 + $0x1f8] sm:$0xff]  ;;  %v639_v25 = vpack.c.bf16 %v93_v17, %v92_v16  ;;  %v609_v26 = vpack.c.bf16 %v79_v20, %v78_v19 }
  0x3b   :  { %602 = vmatprep.subr.bf16.mxu0 %v601_v0  ;;  %291 = vmatprep.mubr.f32.mxu1 %v44_v21  ;;  %v62_v27 = vld [vmem:[#allocation5 + $0x70] sm:$0xff]  ;;  %v63_v28 = vld [vmem:[#allocation5 + $0x78] sm:$0xff]  ;;  %v641_v30 = vpack.c.bf16 %v111_v23, %v110_v22  ;;  %v128_v32 = vld [vmem:[#allocation5 + $0x280] sm:$0xff] }
  0x3c   :  { %632 = vmatpush3.bf16.msra.mxu1 %v631_v63  ;;  %v94_v29 = vld [vmem:[#allocation5 + $0x170] sm:$0xff]  ;;  %v95_v31 = vld [vmem:[#allocation5 + $0x178] sm:$0xff]  ;;  %v129_v33 = vld [vmem:[#allocation5 + $0x288] sm:$0xff]  ;;  %v611_v34 = vpack.c.bf16 %v63_v28, %v62_v27 }
  0x3d   :  { %634 = vmatprep.subr.bf16.mxu1 %v633_v4  ;;  %v643_v35 = vpack.c.bf16 %v95_v31, %v94_v29  ;;  %v645_v36 = vpack.c.bf16 %v129_v33, %v128_v32  ;;  %v112_v37 = vld [vmem:[#allocation5 + $0x200] sm:$0xff]  ;;  %v113_v38 = vld [vmem:[#allocation5 + $0x208] sm:$0xff]  ;;  %v130_v39 = vld [vmem:[#allocation5 + $0x290] sm:$0xff] }
  0x3e   :  { %604 = vmatpush3.bf16.msra.mxu0 %v603_v10  ;;  %v131_v40 = vld [vmem:[#allocation5 + $0x298] sm:$0xff]  ;;  %v41_v41 = vld [vmem:[#allocation2] sm:$0xff]  ;;  %v647_v42 = vpack.c.bf16 %v113_v38, %v112_v37  ;;  %v114_v44 = vld [vmem:[#allocation5 + $0x210] sm:$0xff] }
  0x3f   :  { %606 = vmatprep.subr.bf16.mxu0 %v605_v14  ;;  %v43_v43 = vld [vmem:[#allocation2 + $0x10] sm:$0xff]  ;;  %v649_v45 = vpack.c.bf16 %v131_v40, %v130_v39  ;;  %v132_v47 = vld [vmem:[#allocation5 + $0x2a0] sm:$0xff]  ;;  %v133_v48 = vld [vmem:[#allocation5 + $0x2a8] sm:$0xff] }
  0x40   :  { %636 = vmatpush3.bf16.msra.mxu1 %v635_v13  ;;  %v115_v46 = vld [vmem:[#allocation5 + $0x218] sm:$0xff]  ;;  %v46_v49 = vld [vmem:[#allocation2 + $0x28] sm:$0xff]  ;;  %v144_v51 = vld [vmem:[#allocation5 + $0x300] sm:$0xff]  ;;  %v653_v55 = vpack.c.bf16 %v133_v48, %v132_v47 }
  0x41   :  { %638 = vmatprep.subr.bf16.mxu1 %v637_v18  ;;  %v145_v52 = vld [vmem:[#allocation5 + $0x308] sm:$0xff]  ;;  %v651_v54 = vpack.c.bf16 %v115_v46, %v114_v44  ;;  %v116_v56 = vld [vmem:[#allocation5 + $0x220] sm:$0xff]  ;;  %v134_v58 = vld [vmem:[#allocation5 + $0x2b0] sm:$0xff] }
  0x42   :  { %608 = vmatpush3.bf16.msra.mxu0 %v607_v24  ;;  %v678_v53 = vpack.c.bf16 %v145_v52, %v144_v51  ;;  %v117_v57 = vld [vmem:[#allocation5 + $0x228] sm:$0xff]  ;;  %v135_v59 = vld [vmem:[#allocation5 + $0x2b8] sm:$0xff]  ;;  %v118_v0 = vld [vmem:[#allocation5 + $0x230] sm:$0xff] }
  0x43   :  { %610 = vmatprep.subr.bf16.mxu0 %v609_v26  ;;  %v47_v61 = vld [vmem:[#allocation2 + $0x30] sm:$0xff]  ;;  %v655_v62 = vpack.c.bf16 %v117_v57, %v116_v56  ;;  %v657_v63 = vpack.c.bf16 %v135_v59, %v134_v58  ;;  %v136_v2 = vld [vmem:[#allocation5 + $0x2c0] sm:$0xff]  ;;  %v137_v3 = vld [vmem:[#allocation5 + $0x2c8] sm:$0xff] }
  0x44   :  { %640 = vmatpush3.bf16.msra.mxu1 %v639_v25  ;;  %v119_v1 = vld [vmem:[#allocation5 + $0x238] sm:$0xff]  ;;  %v661_v5 = vpack.c.bf16 %v137_v3, %v136_v2  ;;  %v120_v6 = vld [vmem:[#allocation5 + $0x240] sm:$0xff]  ;;  %v121_v7 = vld [vmem:[#allocation5 + $0x248] sm:$0xff] }
  0x45   :  { %642 = vmatprep.subr.bf16.mxu1 %v641_v30  ;;  %v659_v4 = vpack.c.bf16 %v119_v1, %v118_v0  ;;  %v138_v8 = vld [vmem:[#allocation5 + $0x2d0] sm:$0xff]  ;;  %v139_v9 = vld [vmem:[#allocation5 + $0x2d8] sm:$0xff]  ;;  %v663_v10 = vpack.c.bf16 %v121_v7, %v120_v6  ;;  %v140_v14 = vld [vmem:[#allocation5 + $0x2e0] sm:$0xff] }
  0x46   :  { %612 = vmatpush3.bf16.msra.mxu0 %v611_v34  ;;  %v665_v11 = vpack.c.bf16 %v139_v9, %v138_v8  ;;  %v122_v12 = vld [vmem:[#allocation5 + $0x250] sm:$0xff]  ;;  %v123_v13 = vld [vmem:[#allocation5 + $0x258] sm:$0xff]  ;;  %v141_v15 = vld [vmem:[#allocation5 + $0x2e8] sm:$0xff] }
  0x47   :  { %646 = vmatprep.subr.bf16.mxu0 %v645_v36  ;;  %v667_v16 = vpack.c.bf16 %v123_v13, %v122_v12  ;;  %v669_v17 = vpack.c.bf16 %v141_v15, %v140_v14  ;;  %v124_v18 = vld [vmem:[#allocation5 + $0x260] sm:$0xff]  ;;  %v125_v19 = vld [vmem:[#allocation5 + $0x268] sm:$0xff]  ;;  %v142_v20 = vld [vmem:[#allocation5 + $0x2f0] sm:$0xff] }
  0x48   :  { %644 = vmatpush3.bf16.msra.mxu1 %v643_v35  ;;  %v143_v21 = vld [vmem:[#allocation5 + $0x2f8] sm:$0xff]  ;;  %v671_v22 = vpack.c.bf16 %v125_v19, %v124_v18  ;;  %v126_v24 = vld [vmem:[#allocation5 + $0x270] sm:$0xff]  ;;  %v45_v27 = vld [vmem:[#allocation2 + $0x20] sm:$0xff] }
  0x49   :  { %677 = vmatprep.subr.bf16.mxu1 %v768_v50  ;;  %222 = vmatmul.mubr.f32.vlgmr.msra.gmra.mrb[0].mxu0 %v41_v41  ;;  %v673_v23 = vpack.c.bf16 %v143_v21, %v142_v20  ;;  %v127_v25 = vld [vmem:[#allocation5 + $0x278] sm:$0xff]  ;;  %v464_v29 = vld [vmem:[%s840_s2] ss:$0 sm:$0xff]  ;;  %s771_s2 = smov [#allocation7]  }
  0x4a   :  { %648 = vmatpush3.bf16.msra.mxu0 %v647_v42  ;;  %361 = vmatprep.mubr.f32.mxu0 %v46_v49  ;;  %v675_v26 = vpack.c.bf16 %v127_v25, %v126_v24  ;;  %s454_s11 = sshll.u32 %s771_s2, 4  ;;  %s455_s11 = int_to_ptr.vmem [resolvable:$true] %s454_s11 }
  0x4b   :  { %292 = vmatmul.mubr.f32.vlgmr.msra.gmra.mrb[0].mxu1 %v43_v43  ;;  %650 = vmatprep.subr.bf16.mxu0 %v649_v45  ;;  %s736_s12 = scalar_lea.vmem %s455_s11, 128  ;;  %p741_p3 = scmp.lt.s32.totalorder %s455_s11, %s455_s11 }
  0x4c   :  { %679 = vmatpush3.bf16.msra.mxu1 %v678_v53  ;;  %578 = vmatprep.mubr.msk.f32.mxu1 %vm769_vm0, %v770_v60  ;;  %p737_p2 = scmp.ne.s32.totalorder %s455_s11, %s736_s12  ;;  %p742_p4 = scmp.lt.s32.totalorder %s736_s12, %s736_s12 }
  0x4e   :  { %652 = vmatpush3.bf16.msra.mxu0 %v651_v54  ;;  %p743_p5 = por %p742_p4, %p741_p3 }
  0x4f   :  { %654 = vmatprep.subr.bf16.mxu0 %v653_v55  ;;  %579 = vmatmul.mubr.msk.f32.vlgmr.msra.gmra.mrb[2].mxu1 %vm153_vm1, %v47_v61 }
  0x50   :  { %p744_p6 = pnand %p743_p5, %p737_p2 }
  0x52   :  { %656 = vmatpush3.bf16.msra.mxu0 %v655_v62 }
  0x53   :  { %658 = vmatprep.subr.bf16.mxu0 %v657_v63 }
  0x56   :  { %660 = vmatpush3.bf16.msra.mxu0 %v659_v4 }
  0x57   :  { %662 = vmatprep.subr.bf16.mxu0 %v661_v5 }
  0x5a   :  { %664 = vmatpush3.bf16.msra.mxu0 %v663_v10 }
  0x5b   :  { %666 = vmatprep.subr.bf16.mxu0 %v665_v11 }
  0x5e   :  { %668 = vmatpush3.bf16.msra.mxu0 %v667_v16 }
  0x5f   :  { %670 = vmatprep.subr.bf16.mxu0 %v669_v17 }
  0x62   :  { %672 = vmatpush3.bf16.msra.mxu0 %v671_v22 }
  0x63   :  { %674 = vmatprep.subr.bf16.mxu0 %v673_v23 }
  0x66   :  { %676 = vmatpush3.bf16.msra.mxu0 %v675_v26 }
  0x69   :  { %362 = vmatmul.mubr.f32.vlgmr.msra.gmra.mrb[2].mxu0 %v45_v27 }
 0x11c   :  { %v498_v28 = vpop.f32.mrb[0].mxu0 }
 0x11d   :  { %v499_v30 = vpop.f32.mrb[1].mxu0 }
 0x11e   :  { %v533_v31 = vpop.f32.mrb[0].mxu1  ;;  %v500_v32 = vadd.f32 %v499_v30, %v498_v28 }
 0x11f   :  { %v534_v33 = vpop.f32.mrb[1].mxu1 }
 0x120   :  { %v535_v34 = vadd.f32 %v534_v33, %v533_v31  ;;  %v224_v35 = vadd.f32 %v500_v32, %v464_v29 }
 0x122   :  { %v294_v36 = vadd.f32 %v535_v34, %v224_v35  ;;  %v433_v37 = vpop.f32.mrb[2].mxu1 }
 0x123   :  { %v580_v38 = vpop.f32.mrb[3].mxu1 }
 0x13c   :  { %v568_v39 = vpop.f32.mrb[2].mxu0 }
 0x13d   :  { %v569_v40 = vpop.f32.mrb[3].mxu0 }
 0x13e   :  { %v570_v41 = vadd.f32 %v569_v40, %v568_v39 }
 0x140   :  { %v364_v42 = vadd.f32 %v570_v41, %v294_v36 }
 0x142   :  { %v434_v43 = vadd.f32 %v433_v37, %v364_v42 }
 0x144   :  { %437 = vmax.xlane.f32.xlu0 %v434_v43 }
 0x1d1   :  { %v438_v44 = vpop.xlane.xlu0 %437 }
 0x1d2   :  { %v439_v45 = vsub.f32 %v434_v43, %v438_v44 }
 0x1d4   :  { %v440_v46 = vmul.f32 1.442695, %v439_v45 }
 0x1d6   :  { %688 = vpow2.f32 %v440_v46 }
 0x1e0   :  { %v689_v47 = vpop.eup %688 }
 0x1e1   :  { %442 = vadd.xlane.f32.xlu0 %v689_v47 }
 0x26e   :  { %v443_v48 = vpop.xlane.xlu0 %442 }
 0x26f   :  { %690 = vlog2.f32 %v443_v48 }
 0x279   :  { %v691_v49 = vpop.eup %690 }
 0x27a   :  { %v445_v50 = vmul.f32 0.6931472, %v691_v49 }
 0x27c   :  { %v446_v51 = vsub.f32 %v439_v45, %v445_v50 }
 0x27e   :  { %447 = vst [vmem:[#allocation7] sm:$0xff] %v446_v51 }
 0x27f   :  { %747 = shalt.err (!%p744_p6)
}
 0x280   :  { %s748_s15 = scalar_lea.hbm %s841_s3, 128 }
 0x281   :  { %p749_p7 = scmp.ne.s32.totalorder %s841_s3, %s748_s15  ;;  %p752_p8 = scmp.lt.u32.totalorder %s748_s15, %s841_s3 }
 0x283   :  { %p754_p9 = pnand %p752_p8, %p749_p7 }
 0x285   :  { %757 = shalt.err (!%p754_p9)
}
 0x286   :  { %457 = dma.vmem_to_hbm [thread:$0]  %s455_s11, 128, %s841_s3, [#allocation4]  }
 0x287   :  { %762 = dma.done.wait [#allocation4], 128  }
 0x288   :  { %763 = vsyncadd [#allocation4], 4294967168 }
 0x289   :  { %461 = vsyncpa [#allocation3], 1 }
 0x28a   :  { %462 = vsyncpa [#allocation6], 1 }
 0x28b   :  { %463 = vsyncpa [#allocation4], 1 }

</bundles_post_ra>
